<compile_context>
chip_gen: v7x
topology: tpu7x:2x2x1
jax: 0.10.0
libtpu: 0.0.40
codegen_flags: <defaults>
</compile_context>

<pallas_src>
import jax
import jax.numpy as jnp
import numpy as np
from jax import lax
from jax.experimental import pallas as pl
from jax.experimental.pallas import tpu as pltpu


def _round_up(x, m):
    return (x + m - 1) // m * m


def _make_kernel(Co_t, compute_dtype):
    def kernel(x_ref, w_ref, inv_ref, mat_ref, o_ref, xm_ref):
        # x_ref:   (Bt, C_in, N)        streamed input tile (compute dtype)
        # w_ref:   (C_in*C_out, Mp)     weights, f32 (accumulation dtype), mode-padded
        # inv_ref: (N, Mp)              LBO_INVERSE.T (compute dtype, mode-padded)
        # mat_ref: (Mp, Np)             LBO_MATRIX.T  (compute dtype, padded)
        # o_ref:   (Bt, C_out, Np)      output tile
        # xm_ref:  (Bt*C_in, Mp) f32    VMEM scratch for the step-1 result
        Bt, C_in, N = x_ref.shape
        _, C_out, Np = o_ref.shape
        Mp = xm_ref.shape[1]

        # ---- Step 1 (MXU): project all Bt*C_in rows onto the LBO modes; park the
        # f32 result in VMEM scratch so step 2 reads rows via the load path instead
        # of slicing a large live register value.
        xm_ref[...] = jnp.dot(x_ref[...].reshape(Bt * C_in, N), inv_ref[...],
                              preferred_element_type=jnp.float32)

        # ---- Steps 2 (VPU, f32 accumulation) + 3 (MXU) fused, chunked over
        # (batch row, C_out chunk) to bound register pressure.
        for b in range(Bt):
            for c0 in range(0, C_out, Co_t):
                def mix(i, acc, b=b, c0=c0):
                    # (1, Mp) xm row, broadcast against the (Co_t, Mp) weight slab.
                    xm_row = xm_ref[pl.ds(b * C_in + i, 1), :]
                    wstart = pl.multiple_of(i * C_out + c0, Co_t)
                    w_blk = w_ref[pl.ds(wstart, Co_t), :]          # (Co_t, Mp) f32
                    return acc + xm_row * w_blk

                z = lax.fori_loop(0, C_in, mix,
                                  jnp.zeros((Co_t, Mp), jnp.float32),
                                  unroll=True)                      # (Co_t, Mp) f32

                # Back-project this chunk (bf16/f32 MXU operands, f32 accumulate).
                o_blk = jnp.dot(z.astype(compute_dtype), mat_ref[...],
                                preferred_element_type=jnp.float32)  # (Co_t, Np)
                o_ref[b, pl.ds(c0, Co_t), :] = o_blk.astype(o_ref.dtype)

    return kernel


def spectral_conv1d(x, weights1, lbo_matrix, lbo_inverse, *,
                    compute_dtype=jnp.bfloat16, batch_tile=None):
    """x: (B, C_in, N) -> (B, C_out, N).

    compute_dtype controls MXU operand / streamed-input precision (default bf16);
    all accumulation is f32 and the output keeps x.dtype."""
    B, C_in, N = x.shape
    C_in_w, C_out, M = weights1.shape
    assert C_in_w == C_in
    assert lbo_matrix.shape == (N, M)
    assert lbo_inverse.shape == (M, N)

    cdtype = jnp.dtype(compute_dtype)
    out_dtype = x.dtype
    Mp = _round_up(M, 128)       # lane-dense mode axis (zero-padded)
    Np = _round_up(N, 128)       # lane-dense output spatial axis (zero-padded)

    # --- Operand prep (once per call; hoisted by XLA when operators are jit consts).
    x_in = jnp.asarray(x, cdtype)                                        # (B, C_in, N)
    lbo_inv_t = jnp.zeros((N, Mp), cdtype).at[:, :M].set(
        jnp.asarray(lbo_inverse, cdtype).T)                              # (N, Mp)
    lbo_mat_t = jnp.zeros((Mp, Np), cdtype).at[:M, :N].set(
        jnp.asarray(lbo_matrix, cdtype).T)                               # (Mp, Np)
    w2d = jnp.zeros((C_in * C_out, Mp), jnp.float32).at[:, :M].set(
        jnp.asarray(weights1, jnp.float32).reshape(C_in * C_out, M))     # (C_in*C_out, Mp)

    # --- C_out chunk: largest divisor of C_out <= 32 (bounds live vregs in step 2/3).
    Co_t = 1
    for d in range(1, min(C_out, 32) + 1):
        if C_out % d == 0:
            Co_t = d

    # --- VMEM budget: query the chip, keep headroom (v7x has only 64 MiB / core).
    try:
        vmem_cap = int(pltpu.get_tpu_info().vmem_capacity_bytes)
    except Exception:
        vmem_cap = 64 << 20          # conservative default (v7x per-core)
    budget = (3 * vmem_cap) // 4

    x_b = cdtype.itemsize
    o_b = jnp.dtype(out_dtype).itemsize
    c_b = cdtype.itemsize
    const_bytes = 2 * (C_in * C_out * Mp * 4 + N * Mp * c_b + Mp * Np * c_b)

    def vmem_needed(bt):
        stream = 2 * bt * C_in * N * x_b + 2 * bt * C_out * Np * o_b   # dbl-buffered x/out tiles
        scratch = bt * C_in * Mp * 4                                   # xm scratch
        live = bt * C_in * Mp * 4 + Co_t * (Mp + 2 * Np) * 4           # step-1 result + chunk temps
        return stream + scratch + live + const_bytes

    # --- Batch tile: largest divisor of B that (a) leaves >= 2 grid steps so both
    # TensorCores of a 2-TC chip get work, (b) fits the VMEM budget, (c) keeps the
    # per-step streamed tiles in the ~MiB range (good pipelining, low step overhead).
    if batch_tile is None:
        batch_tile = 1
        for bt in range(1, B + 1):
            if B % bt:
                continue
            if B >= 2 and B // bt < 2:
                continue
            if vmem_needed(bt) > budget:
                continue
            if bt * (C_in * N * x_b + C_out * Np * o_b) > (8 << 20):
                continue
            batch_tile = bt
    Bt = batch_tile
    assert B % Bt == 0, "batch_tile must divide B"
    grid = (B // Bt,)

    vmem_limit = int(min(budget, max(vmem_needed(Bt) + (4 << 20), 16 << 20)))

    # --- Truthful scheduling hints (padded = executed sizes).
    flops = 2 * B * (C_in * N * Mp + C_in * C_out * Mp + C_out * Mp * Np)
    bytes_accessed = (B * C_in * N * x_b + C_in * C_out * Mp * 4
                      + N * Mp * c_b + Mp * Np * c_b + B * C_out * Np * o_b)
    cost = pl.CostEstimate(flops=flops, transcendentals=0,
                           bytes_accessed=int(bytes_accessed))

    kernel = _make_kernel(Co_t, cdtype)

    def build(const_mode):
        def const_spec(shape):
            if const_mode is None:
                return pl.BlockSpec(shape, lambda b: (0, 0))
            return pl.BlockSpec(shape, lambda b: (0, 0), pipeline_mode=const_mode)

        grid_spec = pltpu.PrefetchScalarGridSpec(
            num_scalar_prefetch=0,
            grid=grid,
            in_specs=[
                pl.BlockSpec((Bt, C_in, N), lambda b: (b, 0, 0)),   # streamed x tile
                const_spec((C_in * C_out, Mp)),                     # weights (grid-invariant)
                const_spec((N, Mp)),                                # LBO_INVERSE.T (padded)
                const_spec((Mp, Np)),                               # LBO_MATRIX.T  (padded)
            ],
            out_specs=pl.BlockSpec((Bt, C_out, Np), lambda b: (b, 0, 0)),
            scratch_shapes=[pltpu.VMEM((Bt * C_in, Mp), jnp.float32)],
        )
        return pl.pallas_call(
            kernel,
            out_shape=jax.ShapeDtypeStruct((B, C_out, Np), out_dtype),
            grid_spec=grid_spec,
            compiler_params=pltpu.CompilerParams(
                dimension_semantics=("parallel",),
                vmem_limit_bytes=vmem_limit,
            ),
            cost_estimate=cost,
        )

    # Grid-invariant operands only need a single VMEM buffer (their index map is
    # constant); fall back to default double-buffering if pipeline_mode is rejected.
    try:
        out_p = build(pl.Buffered(1))(x_in, w2d, lbo_inv_t, lbo_mat_t)
    except Exception:
        out_p = build(None)(x_in, w2d, lbo_inv_t, lbo_mat_t)

    # NOTE: for very large N, an additional grid axis over N (blocked lbo_mat_t /
    # output, xm accumulator zeroed at n-index 0) would be added here; at these
    # shapes the untiled-N layout fits VMEM comfortably.
    return out_p[:, :, :N]


def reference(x, weights1, lbo_matrix, lbo_inverse):
    # Pure-JAX mirror of the PyTorch forward.
    xt = jnp.transpose(x, (0, 2, 1))                 # (B, N, C_in)
    xm = jnp.einsum('mn,bni->bmi', lbo_inverse, xt)  # (B, M, C_in)
    xm = jnp.transpose(xm, (0, 2, 1))                # (B, C_in, M)
    z = jnp.einsum('bix,iox->box', xm, weights1)     # (B, C_out, M)
    out = jnp.einsum('box,nx->bon', z, lbo_matrix)   # (B, C_out, N)
    return out


if __name__ == "__main__":
    # Small shapes consistent with the module.
    B, C_in, C_out, N, MODES = 2, 4, 4, 16, 8

    key = jax.random.PRNGKey(0)
    k_x, k_w, k_lbo = jax.random.split(key, 3)

    x = jax.random.normal(k_x, (B, C_in, N), dtype=jnp.float32)

    # Deterministic parameter init (mirrors __init__):
    scale = 1.0 / (C_in * C_out)
    weights1 = scale * jax.random.uniform(k_w, (C_in, C_out, MODES), dtype=jnp.float32)

    # Synthetic LBO basis and its (pseudo-)inverse.
    lbo_matrix = jax.random.normal(k_lbo, (N, MODES), dtype=jnp.float32)   # (N, modes1)
    lbo_inverse = jnp.linalg.pinv(lbo_matrix)                              # (modes1, N)

    ref = reference(x, weights1, lbo_matrix, lbo_inverse)

    # Full-precision MXU path: tight tolerance against the f32 reference.
    out_f32 = spectral_conv1d(x, weights1, lbo_matrix, lbo_inverse,
                              compute_dtype=jnp.float32)
    out_f32 = jax.block_until_ready(out_f32)
    assert out_f32.shape == (B, C_out, N)
    np.testing.assert_allclose(np.asarray(out_f32), np.asarray(ref),
                               rtol=1e-5, atol=1e-5)

    # Default path: bf16 MXU operands / streamed input with f32 accumulation.
    out_bf16 = spectral_conv1d(x, weights1, lbo_matrix, lbo_inverse)
    out_bf16 = jax.block_until_ready(out_bf16)
    assert out_bf16.shape == (B, C_out, N)
    np.testing.assert_allclose(np.asarray(out_bf16), np.asarray(ref),
                               rtol=5e-2, atol=5e-2)

    print("KERNEL_OK")
</pallas_src>

<mosaic_0001>
module attributes {stable_mosaic.version = 11 : i64} {
  func.func @kernel(%arg0: i32, %arg1: memref<1x4x16xf32, #tpu.memory_space<vmem>>, %arg2: memref<16x128xf32, #tpu.memory_space<vmem>>, %arg3: memref<16x128xf32, #tpu.memory_space<vmem>>, %arg4: memref<128x128xf32, #tpu.memory_space<vmem>>, %arg5: memref<1x4x128xf32, #tpu.memory_space<vmem>>, %arg6: memref<4x128xf32, #tpu.memory_space<vmem>>) attributes {dimension_semantics = [#tpu.dimension_semantics<parallel>], iteration_bounds = array<i64: 2>, scalar_prefetch = 0 : i64, scratch_operands = 1 : i64, tpu.core_type = #tpu.core_type<tc>, window_params = [{transform_indices = @transform_0, window_bounds = array<i64: 1, 4, 16>}, {pipeline_mode = #tpu.pipeline_mode<synchronous>, transform_indices = @transform_1, window_bounds = array<i64: 16, 128>}, {pipeline_mode = #tpu.pipeline_mode<synchronous>, transform_indices = @transform_2, window_bounds = array<i64: 16, 128>}, {pipeline_mode = #tpu.pipeline_mode<synchronous>, transform_indices = @transform_3, window_bounds = array<i64: 128, 128>}, {transform_indices = @transform_4, window_bounds = array<i64: 1, 4, 128>}]} {
    %c0 = arith.constant 0 : index
    %c0_0 = arith.constant 0 : index
    %c0_1 = arith.constant 0 : index
    %0 = vector.load %arg1[%c0, %c0_0, %c0_1] : memref<1x4x16xf32, #tpu.memory_space<vmem>>, vector<1x4x16xf32>
    %1 = vector.shape_cast %0 : vector<1x4x16xf32> to vector<4x16xf32>
    %c0_2 = arith.constant 0 : index
    %c0_3 = arith.constant 0 : index
    %2 = vector.load %arg3[%c0_2, %c0_3] : memref<16x128xf32, #tpu.memory_space<vmem>>, vector<16x128xf32>
    %cst = arith.constant dense<0.000000e+00> : vector<4x128xf32>
    %3 = tpu.matmul %1, %2, %cst {dimension_numbers = #tpu.dot_dimension_numbers<[1], [0], [0], [1], [0, 0, 1, 1], [], []>} : vector<4x16xf32>, vector<16x128xf32>, vector<4x128xf32> -> vector<4x128xf32>
    %c0_4 = arith.constant 0 : index
    %c0_5 = arith.constant 0 : index
    %4 = vector.load %arg6[%c0_4, %c0_5] : memref<4x128xf32, #tpu.memory_space<vmem>>, vector<4x128xf32>
    tpu.vector_store %arg6[%c0_4, %c0_5], %3 {strides = array<i32>} : memref<4x128xf32, #tpu.memory_space<vmem>>, vector<4x128xf32>,
    %cst_6 = arith.constant 0.000000e+00 : f32
    %5 = vector.broadcast %cst_6 : f32 to vector<4x128xf32>
    %c0_i32 = arith.constant 0 : i32
    %c0_i32_7 = arith.constant 0 : i32
    %6 = arith.addi %c0_i32_7, %c0_i32 : i32
    %7 = arith.index_cast %6 : i32 to index
    %c0_8 = arith.constant 0 : index
    %8 = vector.load %arg6[%7, %c0_8] : memref<4x128xf32, #tpu.memory_space<vmem>>, vector<1x128xf32>
    %c4_i32 = arith.constant 4 : i32
    %9 = arith.muli %c0_i32, %c4_i32 : i32
    %c0_i32_9 = arith.constant 0 : i32
    %10 = arith.addi %9, %c0_i32_9 : i32
    %11 = tpu.assume_multiple %10, 4 : i32
    %12 = arith.index_cast %11 : i32 to index
    %c0_10 = arith.constant 0 : index
    %13 = vector.load %arg2[%12, %c0_10] : memref<16x128xf32, #tpu.memory_space<vmem>>, vector<4x128xf32>
    %14 = vector.broadcast %8 : vector<1x128xf32> to vector<4x128xf32>
    %15 = arith.mulf %14, %13 : vector<4x128xf32>
    %16 = arith.addf %5, %15 : vector<4x128xf32>
    %c1_i32 = arith.constant 1 : i32
    %c0_i32_11 = arith.constant 0 : i32
    %17 = arith.addi %c0_i32_11, %c1_i32 : i32
    %18 = arith.index_cast %17 : i32 to index
    %c0_12 = arith.constant 0 : index
    %19 = vector.load %arg6[%18, %c0_12] : memref<4x128xf32, #tpu.memory_space<vmem>>, vector<1x128xf32>
    %c4_i32_13 = arith.constant 4 : i32
    %20 = arith.muli %c1_i32, %c4_i32_13 : i32
    %c0_i32_14 = arith.constant 0 : i32
    %21 = arith.addi %20, %c0_i32_14 : i32
    %22 = tpu.assume_multiple %21, 4 : i32
    %23 = arith.index_cast %22 : i32 to index
    %c0_15 = arith.constant 0 : index
    %24 = vector.load %arg2[%23, %c0_15] : memref<16x128xf32, #tpu.memory_space<vmem>>, vector<4x128xf32>
    %25 = vector.broadcast %19 : vector<1x128xf32> to vector<4x128xf32>
    %26 = arith.mulf %25, %24 : vector<4x128xf32>
    %27 = arith.addf %16, %26 : vector<4x128xf32>
    %c2_i32 = arith.constant 2 : i32
    %c0_i32_16 = arith.constant 0 : i32
    %28 = arith.addi %c0_i32_16, %c2_i32 : i32
    %29 = arith.index_cast %28 : i32 to index
    %c0_17 = arith.constant 0 : index
    %30 = vector.load %arg6[%29, %c0_17] : memref<4x128xf32, #tpu.memory_space<vmem>>, vector<1x128xf32>
    %c4_i32_18 = arith.constant 4 : i32
    %31 = arith.muli %c2_i32, %c4_i32_18 : i32
    %c0_i32_19 = arith.constant 0 : i32
    %32 = arith.addi %31, %c0_i32_19 : i32
    %33 = tpu.assume_multiple %32, 4 : i32
    %34 = arith.index_cast %33 : i32 to index
    %c0_20 = arith.constant 0 : index
    %35 = vector.load %arg2[%34, %c0_20] : memref<16x128xf32, #tpu.memory_space<vmem>>, vector<4x128xf32>
    %36 = vector.broadcast %30 : vector<1x128xf32> to vector<4x128xf32>
    %37 = arith.mulf %36, %35 : vector<4x128xf32>
    %38 = arith.addf %27, %37 : vector<4x128xf32>
    %c3_i32 = arith.constant 3 : i32
    %c0_i32_21 = arith.constant 0 : i32
    %39 = arith.addi %c0_i32_21, %c3_i32 : i32
    %40 = arith.index_cast %39 : i32 to index
    %c0_22 = arith.constant 0 : index
    %41 = vector.load %arg6[%40, %c0_22] : memref<4x128xf32, #tpu.memory_space<vmem>>, vector<1x128xf32>
    %c4_i32_23 = arith.constant 4 : i32
    %42 = arith.muli %c3_i32, %c4_i32_23 : i32
    %c0_i32_24 = arith.constant 0 : i32
    %43 = arith.addi %42, %c0_i32_24 : i32
    %44 = tpu.assume_multiple %43, 4 : i32
    %45 = arith.index_cast %44 : i32 to index
    %c0_25 = arith.constant 0 : index
    %46 = vector.load %arg2[%45, %c0_25] : memref<16x128xf32, #tpu.memory_space<vmem>>, vector<4x128xf32>
    %47 = vector.broadcast %41 : vector<1x128xf32> to vector<4x128xf32>
    %48 = arith.mulf %47, %46 : vector<4x128xf32>
    %49 = arith.addf %38, %48 : vector<4x128xf32>
    %c4_i32_26 = arith.constant 4 : i32
    %c0_27 = arith.constant 0 : index
    %c0_28 = arith.constant 0 : index
    %50 = vector.load %arg4[%c0_27, %c0_28] : memref<128x128xf32, #tpu.memory_space<vmem>>, vector<128x128xf32>
    %cst_29 = arith.constant dense<0.000000e+00> : vector<4x128xf32>
    %51 = tpu.matmul %49, %50, %cst_29 {dimension_numbers = #tpu.dot_dimension_numbers<[1], [0], [0], [1], [0, 0, 1, 1], [], []>} : vector<4x128xf32>, vector<128x128xf32>, vector<4x128xf32> -> vector<4x128xf32>
    %c0_30 = arith.constant 0 : index
    %c0_31 = arith.constant 0 : index
    %c0_32 = arith.constant 0 : index
    %52 = vector.load %arg5[%c0_30, %c0_31, %c0_32] : memref<1x4x128xf32, #tpu.memory_space<vmem>>, vector<1x4x128xf32>
    %53 = vector.shape_cast %52 : vector<1x4x128xf32> to vector<4x128xf32>
    %54 = vector.shape_cast %51 : vector<4x128xf32> to vector<1x4x128xf32>
    tpu.vector_store %arg5[%c0_30, %c0_31, %c0_32], %54 {strides = array<i32>} : memref<1x4x128xf32, #tpu.memory_space<vmem>>, vector<1x4x128xf32>,
    return
  }
  func.func @transform_0(%arg0: i32) -> (i32, i32, i32) {
    %c0_i32 = arith.constant 0 : i32
    %c0_i32_0 = arith.constant 0 : i32
    %c0_i32_1 = arith.constant 0 : i32
    return %arg0, %c0_i32, %c0_i32_0 : i32, i32, i32
  }
  func.func @transform_1(%arg0: i32) -> (i32, i32) {
    %c0_i32 = arith.constant 0 : i32
    %c0_i32_0 = arith.constant 0 : i32
    %c0_i32_1 = arith.constant 0 : i32
    return %c0_i32, %c0_i32_0 : i32, i32
  }
  func.func @transform_2(%arg0: i32) -> (i32, i32) {
    %c0_i32 = arith.constant 0 : i32
    %c0_i32_0 = arith.constant 0 : i32
    %c0_i32_1 = arith.constant 0 : i32
    return %c0_i32, %c0_i32_0 : i32, i32
  }
  func.func @transform_3(%arg0: i32) -> (i32, i32) {
    %c0_i32 = arith.constant 0 : i32
    %c0_i32_0 = arith.constant 0 : i32
    %c0_i32_1 = arith.constant 0 : i32
    return %c0_i32, %c0_i32_0 : i32, i32
  }
  func.func @transform_4(%arg0: i32) -> (i32, i32, i32) {
    %c0_i32 = arith.constant 0 : i32
    %c0_i32_0 = arith.constant 0 : i32
    %c0_i32_1 = arith.constant 0 : i32
    return %arg0, %c0_i32, %c0_i32_0 : i32, i32, i32
  }
}

module attributes {stable_mosaic.version = 11 : i64} {
  func.func @kernel(%arg0: i32, %arg1: memref<1x4x16xf32, #tpu.memory_space<vmem>>, %arg2: memref<16x128xf32, #tpu.memory_space<vmem>>, %arg3: memref<16x128xf32, #tpu.memory_space<vmem>>, %arg4: memref<128x128xf32, #tpu.memory_space<vmem>>, %arg5: memref<1x4x128xf32, #tpu.memory_space<vmem>>, %arg6: memref<4x128xf32, #tpu.memory_space<vmem>>) attributes {dimension_semantics = [#tpu.dimension_semantics<parallel>], iteration_bounds = array<i64: 2>, scalar_prefetch = 0 : i64, scratch_operands = 1 : i64, tpu.core_type = #tpu.core_type<tc>, window_params = [{transform_indices = @transform_0, window_bounds = array<i64: 1, 4, 16>}, {pipeline_mode = #tpu.pipeline_mode<synchronous>, transform_indices = @transform_1, window_bounds = array<i64: 16, 128>}, {pipeline_mode = #tpu.pipeline_mode<synchronous>, transform_indices = @transform_2, window_bounds = array<i64: 16, 128>}, {pipeline_mode = #tpu.pipeline_mode<synchronous>, transform_indices = @transform_3, window_bounds = array<i64: 128, 128>}, {transform_indices = @transform_4, window_bounds = array<i64: 1, 4, 128>}]} {
    %c0 = arith.constant 0 : index
    %c0_0 = arith.constant 0 : index
    %c0_1 = arith.constant 0 : index
    %0 = vector.load %arg1[%c0, %c0_0, %c0_1] : memref<1x4x16xf32, #tpu.memory_space<vmem>>, vector<1x4x16xf32>
    %1 = vector.shape_cast %0 : vector<1x4x16xf32> to vector<4x16xf32>
    %c0_2 = arith.constant 0 : index
    %c0_3 = arith.constant 0 : index
    %2 = vector.load %arg3[%c0_2, %c0_3] : memref<16x128xf32, #tpu.memory_space<vmem>>, vector<16x128xf32>
    %cst = arith.constant dense<0.000000e+00> : vector<4x128xf32>
    %3 = tpu.matmul %1, %2, %cst {dimension_numbers = #tpu.dot_dimension_numbers<[1], [0], [0], [1], [0, 0, 1, 1], [], []>} : vector<4x16xf32>, vector<16x128xf32>, vector<4x128xf32> -> vector<4x128xf32>
    %c0_4 = arith.constant 0 : index
    %c0_5 = arith.constant 0 : index
    %4 = vector.load %arg6[%c0_4, %c0_5] : memref<4x128xf32, #tpu.memory_space<vmem>>, vector<4x128xf32>
    tpu.vector_store %arg6[%c0_4, %c0_5], %3 {strides = array<i32>} : memref<4x128xf32, #tpu.memory_space<vmem>>, vector<4x128xf32>,
    %cst_6 = arith.constant 0.000000e+00 : f32
    %5 = vector.broadcast %cst_6 : f32 to vector<4x128xf32>
    %c0_i32 = arith.constant 0 : i32
    %c0_i32_7 = arith.constant 0 : i32
    %6 = arith.addi %c0_i32_7, %c0_i32 : i32
    %7 = arith.index_cast %6 : i32 to index
    %c0_8 = arith.constant 0 : index
    %8 = vector.load %arg6[%7, %c0_8] : memref<4x128xf32, #tpu.memory_space<vmem>>, vector<1x128xf32>
    %c4_i32 = arith.constant 4 : i32
    %9 = arith.muli %c0_i32, %c4_i32 : i32
    %c0_i32_9 = arith.constant 0 : i32
    %10 = arith.addi %9, %c0_i32_9 : i32
    %11 = tpu.assume_multiple %10, 4 : i32
    %12 = arith.index_cast %11 : i32 to index
    %c0_10 = arith.constant 0 : index
    %13 = vector.load %arg2[%12, %c0_10] : memref<16x128xf32, #tpu.memory_space<vmem>>, vector<4x128xf32>
    %14 = vector.broadcast %8 : vector<1x128xf32> to vector<4x128xf32>
    %15 = arith.mulf %14, %13 : vector<4x128xf32>
    %16 = arith.addf %5, %15 : vector<4x128xf32>
    %c1_i32 = arith.constant 1 : i32
    %c0_i32_11 = arith.constant 0 : i32
    %17 = arith.addi %c0_i32_11, %c1_i32 : i32
    %18 = arith.index_cast %17 : i32 to index
    %c0_12 = arith.constant 0 : index
    %19 = vector.load %arg6[%18, %c0_12] : memref<4x128xf32, #tpu.memory_space<vmem>>, vector<1x128xf32>
    %c4_i32_13 = arith.constant 4 : i32
    %20 = arith.muli %c1_i32, %c4_i32_13 : i32
    %c0_i32_14 = arith.constant 0 : i32
    %21 = arith.addi %20, %c0_i32_14 : i32
    %22 = tpu.assume_multiple %21, 4 : i32
    %23 = arith.index_cast %22 : i32 to index
    %c0_15 = arith.constant 0 : index
    %24 = vector.load %arg2[%23, %c0_15] : memref<16x128xf32, #tpu.memory_space<vmem>>, vector<4x128xf32>
    %25 = vector.broadcast %19 : vector<1x128xf32> to vector<4x128xf32>
    %26 = arith.mulf %25, %24 : vector<4x128xf32>
    %27 = arith.addf %16, %26 : vector<4x128xf32>
    %c2_i32 = arith.constant 2 : i32
    %c0_i32_16 = arith.constant 0 : i32
    %28 = arith.addi %c0_i32_16, %c2_i32 : i32
    %29 = arith.index_cast %28 : i32 to index
    %c0_17 = arith.constant 0 : index
    %30 = vector.load %arg6[%29, %c0_17] : memref<4x128xf32, #tpu.memory_space<vmem>>, vector<1x128xf32>
    %c4_i32_18 = arith.constant 4 : i32
    %31 = arith.muli %c2_i32, %c4_i32_18 : i32
    %c0_i32_19 = arith.constant 0 : i32
    %32 = arith.addi %31, %c0_i32_19 : i32
    %33 = tpu.assume_multiple %32, 4 : i32
    %34 = arith.index_cast %33 : i32 to index
    %c0_20 = arith.constant 0 : index
    %35 = vector.load %arg2[%34, %c0_20] : memref<16x128xf32, #tpu.memory_space<vmem>>, vector<4x128xf32>
    %36 = vector.broadcast %30 : vector<1x128xf32> to vector<4x128xf32>
    %37 = arith.mulf %36, %35 : vector<4x128xf32>
    %38 = arith.addf %27, %37 : vector<4x128xf32>
    %c3_i32 = arith.constant 3 : i32
    %c0_i32_21 = arith.constant 0 : i32
    %39 = arith.addi %c0_i32_21, %c3_i32 : i32
    %40 = arith.index_cast %39 : i32 to index
    %c0_22 = arith.constant 0 : index
    %41 = vector.load %arg6[%40, %c0_22] : memref<4x128xf32, #tpu.memory_space<vmem>>, vector<1x128xf32>
    %c4_i32_23 = arith.constant 4 : i32
    %42 = arith.muli %c3_i32, %c4_i32_23 : i32
    %c0_i32_24 = arith.constant 0 : i32
    %43 = arith.addi %42, %c0_i32_24 : i32
    %44 = tpu.assume_multiple %43, 4 : i32
    %45 = arith.index_cast %44 : i32 to index
    %c0_25 = arith.constant 0 : index
    %46 = vector.load %arg2[%45, %c0_25] : memref<16x128xf32, #tpu.memory_space<vmem>>, vector<4x128xf32>
    %47 = vector.broadcast %41 : vector<1x128xf32> to vector<4x128xf32>
    %48 = arith.mulf %47, %46 : vector<4x128xf32>
    %49 = arith.addf %38, %48 : vector<4x128xf32>
    %c4_i32_26 = arith.constant 4 : i32
    %c0_27 = arith.constant 0 : index
    %c0_28 = arith.constant 0 : index
    %50 = vector.load %arg4[%c0_27, %c0_28] : memref<128x128xf32, #tpu.memory_space<vmem>>, vector<128x128xf32>
    %cst_29 = arith.constant dense<0.000000e+00> : vector<4x128xf32>
    %51 = tpu.matmul %49, %50, %cst_29 {dimension_numbers = #tpu.dot_dimension_numbers<[1], [0], [0], [1], [0, 0, 1, 1], [], []>} : vector<4x128xf32>, vector<128x128xf32>, vector<4x128xf32> -> vector<4x128xf32>
    %c0_30 = arith.constant 0 : index
    %c0_31 = arith.constant 0 : index
    %c0_32 = arith.constant 0 : index
    %52 = vector.load %arg5[%c0_30, %c0_31, %c0_32] : memref<1x4x128xf32, #tpu.memory_space<vmem>>, vector<1x4x128xf32>
    %53 = vector.shape_cast %52 : vector<1x4x128xf32> to vector<4x128xf32>
    %54 = vector.shape_cast %51 : vector<4x128xf32> to vector<1x4x128xf32>
    tpu.vector_store %arg5[%c0_30, %c0_31, %c0_32], %54 {strides = array<i32>} : memref<1x4x128xf32, #tpu.memory_space<vmem>>, vector<1x4x128xf32>,
    return
  }
  func.func @transform_0(%arg0: i32) -> (i32, i32, i32) {
    %c0_i32 = arith.constant 0 : i32
    %c0_i32_0 = arith.constant 0 : i32
    %c0_i32_1 = arith.constant 0 : i32
    return %arg0, %c0_i32, %c0_i32_0 : i32, i32, i32
  }
  func.func @transform_1(%arg0: i32) -> (i32, i32) {
    %c0_i32 = arith.constant 0 : i32
    %c0_i32_0 = arith.constant 0 : i32
    %c0_i32_1 = arith.constant 0 : i32
    return %c0_i32, %c0_i32_0 : i32, i32
  }
  func.func @transform_2(%arg0: i32) -> (i32, i32) {
    %c0_i32 = arith.constant 0 : i32
    %c0_i32_0 = arith.constant 0 : i32
    %c0_i32_1 = arith.constant 0 : i32
    return %c0_i32, %c0_i32_0 : i32, i32
  }
  func.func @transform_3(%arg0: i32) -> (i32, i32) {
    %c0_i32 = arith.constant 0 : i32
    %c0_i32_0 = arith.constant 0 : i32
    %c0_i32_1 = arith.constant 0 : i32
    return %c0_i32, %c0_i32_0 : i32, i32
  }
  func.func @transform_4(%arg0: i32) -> (i32, i32, i32) {
    %c0_i32 = arith.constant 0 : i32
    %c0_i32_0 = arith.constant 0 : i32
    %c0_i32_1 = arith.constant 0 : i32
    return %arg0, %c0_i32, %c0_i32_0 : i32, i32, i32
  }
}

</mosaic_0001>

<bundles_post_ra>
// kernel: tpu_custom_call.1
= control target key start
LH: loop header
LB: loop body
LE: loop exit
PB: predicated region body
PF: predicated region fallthrough
CT: control target
= control target key end

     0   :  { %9 = vsyncpa [#allocation4], 0  ;;  %s1256_s0 = inlined_call_operand.hbm [shape: f32[2,4,16], index: 0, kind: input, shape index: {}]   ;;  %s1257_s1 = inlined_call_operand.hbm [shape: f32[16,128], index: 1, kind: input, shape index: {}]   ;;  %s1258_s2 = inlined_call_operand.hbm [shape: f32[16,128], index: 2, kind: input, shape index: {}]   ;;  %s1259_s3 = inlined_call_operand.hbm [shape: f32[128,128], index: 3, kind: input, shape index: {}]   ;;  %s1260_s4 = inlined_call_operand.hbm [shape: f32[2,4,128], index: 4, kind: output, shape index: {}]  }
   0x1   :  { %11 = vsyncpa [#allocation4 + $0x1], 0 }
   0x2   :  { %12 = vsyncpa [#allocation7], 0 }
   0x3   :  { %13 = vsyncpa [#allocation10], 0 }
   0x4   :  { %14 = vsyncpa [#allocation5], 0 }
   0x5   :  { %16 = vsyncpa [#allocation5 + $0x1], 0  ;;  %s989_s15 = smov 0   ;;  %s991_s16 = smov 0  }
   0x6   :  { %s993_s17 = smov 0   ;;  %s995_s18 = smov 0  }
   0x7 LB: > { %s1010_s19 = sadd.s32 4294967295, %s952_s18   ;;  %s570_s20 = sadd.s32 4294967294, %s952_s18   ;;  %s952_s18 = sphi %s995_s18, %s1283_s18   ;;  %s948_s17 = sphi %s993_s17, %s1282_s17   ;;  %s944_s16 = sphi %s991_s16, %s1281_s16   ;;  %s940_s15 = sphi %s989_s15, %s1280_s15  }
   0x8   : > { %p42_p0 = scmp.ne.s32.totalorder %s944_s16, %s940_s15  ;;  %p1261_p1 = scmp.eq.s32.totalorder %s1010_s19, 0 }
   0x9   : > { %p135_p3 = scmp.eq.s32.totalorder %s570_s20, 1  ;;  %p571_p5 = scmp.ge.s32.totalorder %s952_s18, 1 }
   0xa   : > { %p1019_p4 = por %p1261_p1, %p42_p0  ;;  %p142_p7 = scmp.lt.s32.totalorder %s952_s18, 3 }
   0xb   : > { %p1024_p6 = por %p135_p3, %p42_p0  ;;  %s954_s24 = smov [#allocation6]  }
   0xc   : > { %s1264_s21 = scalar_select %p1019_p4, 1, 0 }
   0xd   : > { %s1265_s22 = scalar_select %p1024_p6, 1, 0 }
   0xe   : > { %p1029_p8 = pnand %p571_p5, %p142_p7  ;;  %s154_s25 = sshll.u32 %s954_s24, 4  ;;  %s1033_s25 = int_to_ptr.vmem [resolvable:$true] %s154_s25 }
   0xf   : > { %s955_s27 = smov [#allocation8]   ;;  %s956_s29 = smov [#allocation9]  }
  0x10   : > { %s1266_s23 = scalar_select %p1029_p8, 1, 0 }
  0x11   : > { %p698_p9 = pneg %p1029_p8  ;;  %s167_s28 = sshll.u32 %s955_s27, 4  ;;  %s1044_s28 = int_to_ptr.vmem [resolvable:$true] %s167_s28 }
  0x12   : > { %s1046_s30 = sshll.u32 %s956_s29, 4  ;;  %s764_s7 = scalar_lea.hbm %s1257_s1, 256  ;;  %s181_s30 = int_to_ptr.vmem [resolvable:$true] %s1046_s30 }
  0x13   : > { %p1040_p11 = pnand %p698_p9, %p1261_p1  ;;  %p765_p12 = scmp.ne.s32.totalorder %s1257_s1, %s764_s7 }
  0x14   : > { %p771_p5 = scmp.lt.u32.totalorder %s764_s7, %s1257_s1 }
  0x15   : > { %p1056_p13 = pneg %p1040_p11 }
  0x17   : > { %p767_p0 = pnand %p1056_p13, %p765_p12 }
  0x19   : > { %p768_p3 = pneg %p767_p0 }
  0x1b   : > { %p773_p7 = pnand %p771_p5, %p768_p3 }
  0x1d   : > { %776 = shalt.err (!%p773_p7)
}
  0x1e   : > { %s777_s13 = scalar_lea.vmem %s1033_s25, 256  ;;  %p785_p2 = scmp.lt.s32.totalorder %s1033_s25, %s1033_s25 }
  0x1f   : > { %p778_p9 = scmp.ne.s32.totalorder %s1033_s25, %s777_s13  ;;  %p786_p6 = scmp.lt.s32.totalorder %s777_s13, %s777_s13 }
  0x21   : > { %p780_p10 = pnand %p778_p9, %p1056_p13  ;;  %p787_p12 = por %p786_p6, %p785_p2 }
  0x23   : > { %p781_p1 = pneg %p780_p10 }
  0x25   : > { %p788_p0 = pnand %p787_p12, %p781_p1 }
  0x27   : > { %791 = shalt.err (!%p788_p0)
}
  0x28   : > { %s957_s14 = smov 128   ;;  %s958_s20 = smov 8  }
  0x29   : > { %701 = dma.hbm_to_vmem [thread:$0]  (!%p1040_p11), %s1257_s1, 256, %s1033_s25, [#allocation7], %s957_s14, %s957_s14, %s958_s20  }
  0x2a   : > { %s792_s6 = scalar_lea.hbm %s1258_s2, 256 }
  0x2b   : > { %p793_p1 = scmp.ne.s32.totalorder %s1258_s2, %s792_s6  ;;  %p799_p10 = scmp.lt.u32.totalorder %s792_s6, %s1258_s2 }
  0x2d   : > { %p795_p2 = pnand %p793_p1, %p1056_p13 }
  0x2f   : > { %p796_p6 = pneg %p795_p2 }
  0x31   : > { %p801_p3 = pnand %p799_p10, %p796_p6 }
  0x33   : > { %804 = shalt.err (!%p801_p3)
}
  0x34   : > { %s805_s25 = scalar_lea.vmem %s1044_s28, 256  ;;  %p813_p12 = scmp.lt.s32.totalorder %s1044_s28, %s1044_s28 }
  0x35   : > { %p806_p5 = scmp.ne.s32.totalorder %s1044_s28, %s805_s25  ;;  %p814_p0 = scmp.lt.s32.totalorder %s805_s25, %s805_s25 }
  0x37   : > { %p808_p7 = pnand %p806_p5, %p1056_p13  ;;  %p815_p1 = por %p814_p0, %p813_p12 }
  0x39   : > { %p809_p9 = pneg %p808_p7 }
  0x3b   : > { %p816_p2 = pnand %p815_p1, %p809_p9 }
  0x3d   : > { %819 = shalt.err (!%p816_p2)
}
  0x3e   : > { %704 = dma.hbm_to_vmem [thread:$0]  (!%p1040_p11), %s1258_s2, 256, %s1044_s28, [#allocation7], %s957_s14, %s957_s14, %s958_s20  }
  0x3f   : > { %s820_s29 = scalar_lea.hbm %s1259_s3, 2048 }
  0x40   : > { %p821_p6 = scmp.ne.s32.totalorder %s1259_s3, %s820_s29  ;;  %p827_p5 = scmp.lt.u32.totalorder %s820_s29, %s1259_s3 }
  0x42   : > { %p823_p10 = pnand %p821_p6, %p1056_p13 }
  0x44   : > { %p824_p3 = pneg %p823_p10 }
  0x46   : > { %p829_p7 = pnand %p827_p5, %p824_p3 }
  0x48   : > { %832 = shalt.err (!%p829_p7)
}
  0x49   : > { %s833_s9 = scalar_lea.vmem %s181_s30, 2048  ;;  %p841_p1 = scmp.lt.s32.totalorder %s181_s30, %s181_s30 }
  0x4a   : > { %p834_p9 = scmp.ne.s32.totalorder %s181_s30, %s833_s9  ;;  %p842_p2 = scmp.lt.s32.totalorder %s833_s9, %s833_s9 }
  0x4c   : > { %p836_p12 = pnand %p834_p9, %p1056_p13  ;;  %p843_p4 = por %p842_p2, %p841_p1 }
  0x4e   : > { %p837_p0 = pneg %p836_p12 }
  0x50   : > { %p844_p8 = pnand %p843_p4, %p837_p0 }
  0x52   : > { %847 = shalt.err (!%p844_p8)
}
  0x53   : > { %707 = dma.hbm_to_vmem [thread:$0]  (!%p1040_p11), %s1259_s3, 2048, %s181_s30, [#allocation10], %s957_s14, %s957_s14, %s958_s20  }
  0x54   : > { %s1129_s10 = sadd.s32 1, %s952_s18   ;;  %s29_s25 = sadd.s32 1, %s948_s17 }
  0x55   : > { %s26_s26 = ssub.s32 %s952_s18, %s1129_s10  ;;  %p36_p8 = scmp.ne.s32.totalorder %s948_s17, %s944_s16 }
  0x56   : > { %p27_p4 = scmp.eq.s32.totalorder %s26_s26, 0  ;;  %p37_p13 = scmp.eq.s32.totalorder %s952_s18, 0 }
  0x57   : > { %p719_p6 = scmp.lt.s32.totalorder %s952_s18, 2  ;;  %p1269_p3 = scmp.eq.s32.totalorder %s1010_s19, 1 }
  0x58   : > { %s1139_s12 = scalar_select %p27_p4, %s948_s17, %s29_s25  }
  0x59   : > { %p38_p10 = por %p37_p13, %p36_p8  ;;  %p1143_p5 = por %p1269_p3, %p36_p8 }
  0x5a   : > { %s194_s24 = sand.u32 1, %s948_s17   ;;  %s577_s27 = sshll.u32 %s952_s18, 6 }
  0x5b   : > { %s576_s30 = sshll.u32 %s194_s24, 2  ;;  %s1152_s29 = scalar_lea.hbm %s1256_s0, %s577_s27 }
  0x5c   : > { %s198_s5 = scalar_lea.vmem [#allocation3], %s576_s30  ;;  %p1154_p11 = pnand %p719_p6, %p38_p10 }
  0x5d   : > { %s205_s6 = sshll.u32 %s198_s5, 4  ;;  %s195_s8 = scalar_lea.sflag [#allocation4], %s194_s24  ;;  %s1158_s6 = int_to_ptr.vmem [resolvable:$true] %s205_s6 }
  0x5e   : > { %s848_s9 = scalar_lea.hbm %s1152_s29, 64  ;;  %p850_p9 = pneg %p1154_p11 }
  0x5f   : > { %p849_p7 = scmp.ne.s32.totalorder %s1152_s29, %s848_s9  ;;  %s853_s26 = scalar_lea.hbm %s1256_s0, 128 }
  0x60   : > { %p854_p1 = scmp.lt.u32.totalorder %s1152_s29, %s1256_s0  ;;  %p855_p2 = scmp.lt.u32.totalorder %s853_s26, %s848_s9 }
  0x61   : > { %p851_p12 = pnand %p850_p9, %p849_p7  ;;  %p857_p8 = scmp.lt.u32.totalorder %s848_s9, %s1152_s29 }
  0x62   : > { %p856_p4 = por %p855_p2, %p854_p1 }
  0x63   : > { %p852_p0 = pneg %p851_p12 }
  0x64   : > { %p858_p13 = por %p857_p8, %p856_p4 }
  0x66   : > { %p859_p6 = pnand %p858_p13, %p852_p0 }
  0x68   : > { %862 = shalt.err (!%p859_p6)
}
  0x69   : > { %s863_s24 = scalar_lea.vmem %s1158_s6, 64  ;;  %s959_s30 = smov [#allocation3]  }
  0x6a   : > { %p864_p10 = scmp.ne.s32.totalorder %s1158_s6, %s863_s24  ;;  %s868_s14 = sshll.u32 %s959_s30, 4  ;;  %s869_s14 = int_to_ptr.vmem [resolvable:$false] %s868_s14 }
  0x6b   : > { %s870_s20 = scalar_lea.vmem %s869_s14, 128  ;;  %p871_p12 = scmp.lt.s32.totalorder %s1158_s6, %s869_s14 }
  0x6c   : > { %p866_p3 = pnand %p864_p10, %p850_p9  ;;  %p872_p1 = scmp.lt.s32.totalorder %s870_s20, %s863_s24 }
  0x6e   : > { %p867_p7 = pneg %p866_p3  ;;  %p873_p2 = por %p872_p1, %p871_p12 }
  0x70   : > { %p874_p4 = pnand %p873_p2, %p867_p7 }
  0x72   : > { %877 = shalt.err (!%p874_p4)
}
  0x73   : > { %711 = dma.hbm_to_vmem [thread:$0]  (!%p1154_p11), %s1152_s29, 64, %s1158_s6, %s195_s8  }
  0x74   : > { %p1272_p0 = scmp.ne.s32.totalorder %s1266_s23, 0 }
  0x75   : > { %s1188_s5 = sand.u32 (!%p1272_p0), 1, %s944_s16   ;;  %p1273_p9 = scmp.ne.s32.totalorder (!%p1272_p0), %s1264_s21, 0 }
  0x76   : > { %214 = sbr.rel (%p1272_p0) target bundleno = 594 (0x252), region = 36  ;;  %s579_s9 = sshll.u32 (!%p1272_p0), %s1188_s5, 2 }
  0x77   : > { %s217_s28 = scalar_lea.sflag (!%p1272_p0), [#allocation4], %s1188_s5  ;;  %s220_s11 = scalar_lea.vmem (!%p1272_p0), [#allocation3], %s579_s9 }
  0x7d   : > { %923 = dma.done.wait (%p1273_p9), %s217_s28, 64  }
  0x7e   : > { %925 = vsyncadd (%p1273_p9), %s217_s28, 4294967232  ;;  %p1274_p11 = scmp.eq.s32.totalorder %s1010_s19, 0 }
  0x80   : > { %927 = dma.done.wait (%p1274_p11), [#allocation7], 512   ;;  %p1275_p8 = pmov %p1274_p11 }
  0x82   : > { %929 = vsyncadd (%p1275_p8), [#allocation7], 4294966784  ;;  %p1276_p13 = pmov %p1275_p8 }
  0x83   : > { %p1277_p6 = pmov %p1275_p8 }
  0x84   : > { %931 = dma.done.wait (%p1276_p13), [#allocation10], 2048  }
  0x85   : > { %933 = vsyncadd (%p1277_p6), [#allocation10], 4294965248  ;;  %v960_v0 = vmov 0.0|0.0   ;;  %vm961_vm0 = vmmov 0   ;;  %v962_v1 = vmov 0.0   ;;  %v258_v2 = vld [vmem:[#allocation8] sm:$0xff] }
  0x86   : > { %655 = vmatprep.subr.bf16.mxu0 %v960_v0  ;;  %617 = vmatprep.mubr.msk.f32.mxu0 %vm961_vm0, %v962_v1  ;;  %v259_v3 = vld [vmem:[#allocation8 + $0x8] sm:$0xff]  ;;  %v370_v5 = vld [vmem:[#allocation9] sm:$0xff]  ;;  %v371_v6 = vld [vmem:[#allocation9 + $0x8] sm:$0xff]  ;;  %vm260_vm1 = vcmask 130048   ;;  %s256_s21 = scalar_lea.vmem [#allocation11], %s579_s9  ;;  %s590_s29 = sshll.u32 %s1010_s19, 6 }
  0x87   : > { %658 = vmatprep.subr.bf16.mxu1 %v960_v0  ;;  %652 = vmatprep.mubr.msk.f32.mxu1 %vm961_vm0, %v962_v1  ;;  %v656_v4 = vpack.c.bf16 %v259_v3, %v258_v2  ;;  %v372_v7 = vld [vmem:[#allocation9 + $0x10] sm:$0xff]  ;;  %v659_v8 = vpack.c.bf16 %v371_v6, %v370_v5  ;;  %v373_v9 = vld [vmem:[#allocation9 + $0x18] sm:$0xff]  ;;  %v374_v12 = vld [vmem:[#allocation9 + $0x20] sm:$0xff]  ;;  %s471_s23 = sshll.u32 %s256_s21, 4  ;;  %s1214_s8 = scalar_lea.hbm %s1260_s4, %s590_s29  ;;  %s1209_s23 = int_to_ptr.vmem [resolvable:$true] %s471_s23 }
  0x88   : > { %v257_v10 = vld [vmem:[%s220_s11] sm:$0xf]  ;;  %v662_v11 = vpack.c.bf16 %v373_v9, %v372_v7  ;;  %v375_v13 = vld [vmem:[#allocation9 + $0x28] sm:$0xff]  ;;  %v376_v15 = vld [vmem:[#allocation9 + $0x30] sm:$0xff]  ;;  %s458_s26 = scalar_lea.sflag [#allocation5], %s1188_s5  ;;  %s878_s25 = scalar_lea.vmem %s1209_s23, 64 }
  0x89   : > { %657 = vmatpush3.bf16.msra.mxu0 %v656_v4  ;;  %660 = vmatpush3.bf16.msra.mxu1 %v659_v8  ;;  %v665_v14 = vpack.c.bf16 %v375_v13, %v374_v12  ;;  %v377_v16 = vld [vmem:[#allocation9 + $0x38] sm:$0xff]  ;;  %v378_v18 = vld [vmem:[#allocation9 + $0x40] sm:$0xff]  ;;  %v379_v19 = vld [vmem:[#allocation9 + $0x48] sm:$0xff]  ;;  %p879_p10 = scmp.ne.s32.totalorder %s1209_s23, %s878_s25  ;;  %s963_s19 = smov [#allocation11]  }
  0x8a   : > { %661 = vmatprep.subr.bf16.mxu1 %v960_v0  ;;  %v668_v17 = vpack.c.bf16 %v377_v16, %v376_v15  ;;  %v671_v20 = vpack.c.bf16 %v379_v19, %v378_v18  ;;  %v380_v21 = vld [vmem:[#allocation9 + $0x50] sm:$0xff]  ;;  %v381_v22 = vld [vmem:[#allocation9 + $0x58] sm:$0xff]  ;;  %v382_v24 = vld [vmem:[#allocation9 + $0x60] sm:$0xff]  ;;  %s882_s27 = sshll.u32 %s963_s19, 4  ;;  %s883_s27 = int_to_ptr.vmem [resolvable:$false] %s882_s27 }
  0x8b   : > { %v674_v23 = vpack.c.bf16 %v381_v22, %v380_v21  ;;  %v383_v25 = vld [vmem:[#allocation9 + $0x68] sm:$0xff]  ;;  %v384_v27 = vld [vmem:[#allocation9 + $0x70] sm:$0xff]  ;;  %v385_v28 = vld [vmem:[#allocation9 + $0x78] sm:$0xff]  ;;  %p880_p3 = pnand %p879_p10, %p1143_p5  ;;  %s884_s24 = scalar_lea.vmem %s883_s27, 128 }
  0x8c   : > { %618 = vmatmul.mubr.msk.f32.vlgmr.msra.gmra.mrb[0].mxu0 %vm260_vm1, %v257_v10  ;;  %v677_v26 = vpack.c.bf16 %v383_v25, %v382_v24  ;;  %v680_v29 = vpack.c.bf16 %v385_v28, %v384_v27  ;;  %v336_v32 = vld [vmem:[#allocation6] sm:$0xf]  ;;  %v345_v33 = vld [vmem:[#allocation6 + $0x4] sm:$0xf]  ;;  %v354_v34 = vld [vmem:[#allocation6 + $0x8] sm:$0xf]  ;;  %p885_p12 = scmp.lt.s32.totalorder %s1209_s23, %s883_s27  ;;  %p886_p1 = scmp.lt.s32.totalorder %s884_s24, %s878_s25 }
  0x8d   : > { %663 = vmatpush3.bf16.msra.mxu1 %v662_v11  ;;  %v363_v41 = vld [vmem:[#allocation6 + $0xc] sm:$0xf]  ;;  %p881_p7 = pneg %p880_p3 }
  0x8e   : > { %664 = vmatprep.subr.bf16.mxu1 %v960_v0  ;;  %p887_p2 = por %p886_p1, %p885_p12 }
  0x90   : > { %p888_p4 = pnand %p887_p2, %p881_p7 }
  0x91   : > { %666 = vmatpush3.bf16.msra.mxu1 %v665_v14 }
  0x92   : > { %667 = vmatprep.subr.bf16.mxu1 %v960_v0 }
  0x95   : > { %669 = vmatpush3.bf16.msra.mxu1 %v668_v17 }
  0x96   : > { %670 = vmatprep.subr.bf16.mxu1 %v960_v0 }
  0x99   : > { %672 = vmatpush3.bf16.msra.mxu1 %v671_v20 }
  0x9a   : > { %673 = vmatprep.subr.bf16.mxu1 %v960_v0 }
  0x9d   : > { %675 = vmatpush3.bf16.msra.mxu1 %v674_v23 }
  0x9e   : > { %676 = vmatprep.subr.bf16.mxu1 %v960_v0 }
  0xa1   : > { %678 = vmatpush3.bf16.msra.mxu1 %v677_v26 }
  0xa2   : > { %679 = vmatprep.subr.bf16.mxu1 %v960_v0 }
  0xa5   : > { %681 = vmatpush3.bf16.msra.mxu1 %v680_v29 }
 0x15f   : > { %v330_v30 = vpop.f32.mrb[0].mxu0 }
 0x160   : > { %334 = vst [vmem:[#allocation2] sm:$0xf] %v330_v30  ;;  %v619_v31 = vpop.f32.mrb[1].mxu0 }
 0x167   : > { %v585_v35 = vld [vmem:[#allocation2] ss:$0 sm:$0xff]  ;;  %v586_v36 = vld [vmem:[#allocation2 + $0x1] ss:$0 sm:$0xff]  ;;  %v587_v37 = vld [vmem:[#allocation2 + $0x2] ss:$0 sm:$0xff] }
 0x168   : > { %v341_v38 = vmul.f32 %v585_v35, %v336_v32  ;;  %v350_v39 = vmul.f32 %v586_v36, %v345_v33  ;;  %v588_v40 = vld [vmem:[#allocation2 + $0x3] ss:$0 sm:$0xff]  ;;  %v359_v43 = vmul.f32 %v587_v37, %v354_v34 }
 0x169   : > { %v368_v45 = vmul.f32 %v588_v40, %v363_v41 }
 0x16a   : > { %v351_v42 = vadd.f32 %v350_v39, %v341_v38 }
 0x16c   : > { %v360_v44 = vadd.f32 %v359_v43, %v351_v42 }
 0x16e   : > { %v369_v46 = vadd.f32 %v368_v45, %v360_v44 }
 0x170   : > { %653 = vmatmul.mubr.f32.vlgmr.msra.gmra.mrb[0].mxu1 %v369_v46 }
 0x243   : > { %v452_v47 = vpop.f32.mrb[0].mxu1 }
 0x244   : > { %456 = vst [vmem:[%s256_s21] sm:$0xf] %v452_v47  ;;  %v654_v48 = vpop.f32.mrb[1].mxu1 }
 0x245   : > { %891 = shalt.err (!%p888_p4)
}
 0x246   : > { %s892_s30 = scalar_lea.hbm %s1214_s8, 64  ;;  %s896_s5 = scalar_lea.hbm %s1260_s4, 128 }
 0x247   : > { %p893_p0 = scmp.ne.s32.totalorder %s1214_s8, %s892_s30  ;;  %p897_p8 = scmp.lt.u32.totalorder %s1214_s8, %s1260_s4 }
 0x248   : > { %p898_p13 = scmp.lt.u32.totalorder %s896_s5, %s892_s30  ;;  %p900_p10 = scmp.lt.u32.totalorder %s892_s30, %s1214_s8 }
 0x249   : > { %p894_p9 = pnand %p893_p0, %p1143_p5 }
 0x24a   : > { %p899_p6 = por %p898_p13, %p897_p8 }
 0x24b   : > { %p895_p11 = pneg %p894_p9 }
 0x24c   : > { %p901_p3 = por %p900_p10, %p899_p6 }
 0x24e   : > { %p902_p7 = pnand %p901_p3, %p895_p11 }
 0x250   : > { %905 = shalt.err (!%p902_p7)
}
 0x251   : > { %696 = dma.vmem_to_hbm [thread:$0]  (%p1143_p5), %s1209_s23, 64, %s1214_s8, %s458_s26  }
 0x252 PF: > { %s483_s11 = sand.u32 1, %s940_s15   ;;  %p1278_p12 = scmp.ne.s32.totalorder %s1265_s22, 0 }
 0x253   : > { %p1279_p1 = scmp.ge.s32.totalorder %s952_s18, 2  ;;  %s484_s21 = scalar_lea.sflag [#allocation5], %s483_s11 }
 0x255   : > { %p713_p2 = pnand %p1279_p1, %p1278_p12 }
 0x257   : > { %935 = dma.done.wait (!%p713_p2), %s484_s21, 64  }
 0x258   : > { %937 = vsyncadd (!%p713_p2), %s484_s21, 4294967232  ;;  %p19_p4 = scmp.ge.s32.totalorder %s1129_s10, 4   ;;  %s1280_s15 = smov %s944_s16 }
 0x259   : > { %s1281_s16 = smov %s948_s17  ;;  %s1282_s17 = smov %s1139_s12 }
 0x25a   : > { %s1283_s18 = smov %s1129_s10  ;;  %21 = sbr.rel (!%p19_p4) target bundleno = 7 (0x7), region = 96 }
 0x261   :  { %489 = vsyncpa [#allocation4], 1 }
 0x262   :  { %491 = vsyncpa [#allocation4 + $0x1], 1 }
 0x263   :  { %492 = vsyncpa [#allocation7], 1 }
 0x264   :  { %493 = vsyncpa [#allocation10], 1 }
 0x265   :  { %494 = vsyncpa [#allocation5], 1 }
 0x266   :  { %496 = vsyncpa [#allocation5 + $0x1], 1 }

// kernel: tpu_custom_call.1
= control target key start
LH: loop header
LB: loop body
LE: loop exit
PB: predicated region body
PF: predicated region fallthrough
CT: control target
= control target key end

     0   :  { %9 = vsyncpa [#allocation4], 0  ;;  %s1256_s0 = inlined_call_operand.hbm [shape: f32[2,4,16], index: 0, kind: input, shape index: {}]   ;;  %s1257_s1 = inlined_call_operand.hbm [shape: f32[16,128], index: 1, kind: input, shape index: {}]   ;;  %s1258_s2 = inlined_call_operand.hbm [shape: f32[16,128], index: 2, kind: input, shape index: {}]   ;;  %s1259_s3 = inlined_call_operand.hbm [shape: f32[128,128], index: 3, kind: input, shape index: {}]   ;;  %s1260_s4 = inlined_call_operand.hbm [shape: f32[2,4,128], index: 4, kind: output, shape index: {}]  }
   0x1   :  { %11 = vsyncpa [#allocation4 + $0x1], 0 }
   0x2   :  { %12 = vsyncpa [#allocation7], 0 }
   0x3   :  { %13 = vsyncpa [#allocation10], 0 }
   0x4   :  { %14 = vsyncpa [#allocation5], 0 }
   0x5   :  { %16 = vsyncpa [#allocation5 + $0x1], 0  ;;  %s989_s15 = smov 0   ;;  %s991_s16 = smov 0  }
   0x6   :  { %s993_s17 = smov 0   ;;  %s995_s18 = smov 0  }
   0x7 LB: > { %s1010_s19 = sadd.s32 4294967295, %s952_s18   ;;  %s570_s20 = sadd.s32 4294967294, %s952_s18   ;;  %s952_s18 = sphi %s995_s18, %s1283_s18   ;;  %s948_s17 = sphi %s993_s17, %s1282_s17   ;;  %s944_s16 = sphi %s991_s16, %s1281_s16   ;;  %s940_s15 = sphi %s989_s15, %s1280_s15  }
   0x8   : > { %p42_p0 = scmp.ne.s32.totalorder %s944_s16, %s940_s15  ;;  %p1261_p1 = scmp.eq.s32.totalorder %s1010_s19, 0 }
   0x9   : > { %p135_p3 = scmp.eq.s32.totalorder %s570_s20, 1  ;;  %p571_p5 = scmp.ge.s32.totalorder %s952_s18, 1 }
   0xa   : > { %p1019_p4 = por %p1261_p1, %p42_p0  ;;  %p142_p7 = scmp.lt.s32.totalorder %s952_s18, 3 }
   0xb   : > { %p1024_p6 = por %p135_p3, %p42_p0  ;;  %s954_s24 = smov [#allocation6]  }
   0xc   : > { %s1264_s21 = scalar_select %p1019_p4, 1, 0 }
   0xd   : > { %s1265_s22 = scalar_select %p1024_p6, 1, 0 }
   0xe   : > { %p1029_p8 = pnand %p571_p5, %p142_p7  ;;  %s154_s25 = sshll.u32 %s954_s24, 4  ;;  %s1033_s25 = int_to_ptr.vmem [resolvable:$true] %s154_s25 }
   0xf   : > { %s955_s27 = smov [#allocation8]   ;;  %s956_s29 = smov [#allocation9]  }
  0x10   : > { %s1266_s23 = scalar_select %p1029_p8, 1, 0 }
  0x11   : > { %p698_p9 = pneg %p1029_p8  ;;  %s167_s28 = sshll.u32 %s955_s27, 4  ;;  %s1044_s28 = int_to_ptr.vmem [resolvable:$true] %s167_s28 }
  0x12   : > { %s1046_s30 = sshll.u32 %s956_s29, 4  ;;  %s764_s7 = scalar_lea.hbm %s1257_s1, 256  ;;  %s181_s30 = int_to_ptr.vmem [resolvable:$true] %s1046_s30 }
  0x13   : > { %p1040_p11 = pnand %p698_p9, %p1261_p1  ;;  %p765_p12 = scmp.ne.s32.totalorder %s1257_s1, %s764_s7 }
  0x14   : > { %p771_p5 = scmp.lt.u32.totalorder %s764_s7, %s1257_s1 }
  0x15   : > { %p1056_p13 = pneg %p1040_p11 }
  0x17   : > { %p767_p0 = pnand %p1056_p13, %p765_p12 }
  0x19   : > { %p768_p3 = pneg %p767_p0 }
  0x1b   : > { %p773_p7 = pnand %p771_p5, %p768_p3 }
  0x1d   : > { %776 = shalt.err (!%p773_p7)
}
  0x1e   : > { %s777_s13 = scalar_lea.vmem %s1033_s25, 256  ;;  %p785_p2 = scmp.lt.s32.totalorder %s1033_s25, %s1033_s25 }
  0x1f   : > { %p778_p9 = scmp.ne.s32.totalorder %s1033_s25, %s777_s13  ;;  %p786_p6 = scmp.lt.s32.totalorder %s777_s13, %s777_s13 }
  0x21   : > { %p780_p10 = pnand %p778_p9, %p1056_p13  ;;  %p787_p12 = por %p786_p6, %p785_p2 }
  0x23   : > { %p781_p1 = pneg %p780_p10 }
  0x25   : > { %p788_p0 = pnand %p787_p12, %p781_p1 }
  0x27   : > { %791 = shalt.err (!%p788_p0)
}
  0x28   : > { %s957_s14 = smov 128   ;;  %s958_s20 = smov 8  }
  0x29   : > { %701 = dma.hbm_to_vmem [thread:$0]  (!%p1040_p11), %s1257_s1, 256, %s1033_s25, [#allocation7], %s957_s14, %s957_s14, %s958_s20  }
  0x2a   : > { %s792_s6 = scalar_lea.hbm %s1258_s2, 256 }
  0x2b   : > { %p793_p1 = scmp.ne.s32.totalorder %s1258_s2, %s792_s6  ;;  %p799_p10 = scmp.lt.u32.totalorder %s792_s6, %s1258_s2 }
  0x2d   : > { %p795_p2 = pnand %p793_p1, %p1056_p13 }
  0x2f   : > { %p796_p6 = pneg %p795_p2 }
  0x31   : > { %p801_p3 = pnand %p799_p10, %p796_p6 }
  0x33   : > { %804 = shalt.err (!%p801_p3)
}
  0x34   : > { %s805_s25 = scalar_lea.vmem %s1044_s28, 256  ;;  %p813_p12 = scmp.lt.s32.totalorder %s1044_s28, %s1044_s28 }
  0x35   : > { %p806_p5 = scmp.ne.s32.totalorder %s1044_s28, %s805_s25  ;;  %p814_p0 = scmp.lt.s32.totalorder %s805_s25, %s805_s25 }
  0x37   : > { %p808_p7 = pnand %p806_p5, %p1056_p13  ;;  %p815_p1 = por %p814_p0, %p813_p12 }
  0x39   : > { %p809_p9 = pneg %p808_p7 }
  0x3b   : > { %p816_p2 = pnand %p815_p1, %p809_p9 }
  0x3d   : > { %819 = shalt.err (!%p816_p2)
}
  0x3e   : > { %704 = dma.hbm_to_vmem [thread:$0]  (!%p1040_p11), %s1258_s2, 256, %s1044_s28, [#allocation7], %s957_s14, %s957_s14, %s958_s20  }
  0x3f   : > { %s820_s29 = scalar_lea.hbm %s1259_s3, 2048 }
  0x40   : > { %p821_p6 = scmp.ne.s32.totalorder %s1259_s3, %s820_s29  ;;  %p827_p5 = scmp.lt.u32.totalorder %s820_s29, %s1259_s3 }
  0x42   : > { %p823_p10 = pnand %p821_p6, %p1056_p13 }
  0x44   : > { %p824_p3 = pneg %p823_p10 }
  0x46   : > { %p829_p7 = pnand %p827_p5, %p824_p3 }
  0x48   : > { %832 = shalt.err (!%p829_p7)
}
  0x49   : > { %s833_s9 = scalar_lea.vmem %s181_s30, 2048  ;;  %p841_p1 = scmp.lt.s32.totalorder %s181_s30, %s181_s30 }
  0x4a   : > { %p834_p9 = scmp.ne.s32.totalorder %s181_s30, %s833_s9  ;;  %p842_p2 = scmp.lt.s32.totalorder %s833_s9, %s833_s9 }
  0x4c   : > { %p836_p12 = pnand %p834_p9, %p1056_p13  ;;  %p843_p4 = por %p842_p2, %p841_p1 }
  0x4e   : > { %p837_p0 = pneg %p836_p12 }
  0x50   : > { %p844_p8 = pnand %p843_p4, %p837_p0 }
  0x52   : > { %847 = shalt.err (!%p844_p8)
}
  0x53   : > { %707 = dma.hbm_to_vmem [thread:$0]  (!%p1040_p11), %s1259_s3, 2048, %s181_s30, [#allocation10], %s957_s14, %s957_s14, %s958_s20  }
  0x54   : > { %s1129_s10 = sadd.s32 1, %s952_s18   ;;  %s29_s25 = sadd.s32 1, %s948_s17 }
  0x55   : > { %s26_s26 = ssub.s32 %s952_s18, %s1129_s10  ;;  %p36_p8 = scmp.ne.s32.totalorder %s948_s17, %s944_s16 }
  0x56   : > { %p27_p4 = scmp.eq.s32.totalorder %s26_s26, 0  ;;  %p37_p13 = scmp.eq.s32.totalorder %s952_s18, 0 }
  0x57   : > { %p719_p6 = scmp.lt.s32.totalorder %s952_s18, 2  ;;  %p1269_p3 = scmp.eq.s32.totalorder %s1010_s19, 1 }
  0x58   : > { %s1139_s12 = scalar_select %p27_p4, %s948_s17, %s29_s25  }
  0x59   : > { %p38_p10 = por %p37_p13, %p36_p8  ;;  %p1143_p5 = por %p1269_p3, %p36_p8 }
  0x5a   : > { %s194_s24 = sand.u32 1, %s948_s17   ;;  %s577_s27 = sshll.u32 %s952_s18, 6 }
  0x5b   : > { %s576_s30 = sshll.u32 %s194_s24, 2  ;;  %s1152_s29 = scalar_lea.hbm %s1256_s0, %s577_s27 }
  0x5c   : > { %s198_s5 = scalar_lea.vmem [#allocation3], %s576_s30  ;;  %p1154_p11 = pnand %p719_p6, %p38_p10 }
  0x5d   : > { %s205_s6 = sshll.u32 %s198_s5, 4  ;;  %s195_s8 = scalar_lea.sflag [#allocation4], %s194_s24  ;;  %s1158_s6 = int_to_ptr.vmem [resolvable:$true] %s205_s6 }
  0x5e   : > { %s848_s9 = scalar_lea.hbm %s1152_s29, 64  ;;  %p850_p9 = pneg %p1154_p11 }
  0x5f   : > { %p849_p7 = scmp.ne.s32.totalorder %s1152_s29, %s848_s9  ;;  %s853_s26 = scalar_lea.hbm %s1256_s0, 128 }
  0x60   : > { %p854_p1 = scmp.lt.u32.totalorder %s1152_s29, %s1256_s0  ;;  %p855_p2 = scmp.lt.u32.totalorder %s853_s26, %s848_s9 }
  0x61   : > { %p851_p12 = pnand %p850_p9, %p849_p7  ;;  %p857_p8 = scmp.lt.u32.totalorder %s848_s9, %s1152_s29 }
  0x62   : > { %p856_p4 = por %p855_p2, %p854_p1 }
  0x63   : > { %p852_p0 = pneg %p851_p12 }
  0x64   : > { %p858_p13 = por %p857_p8, %p856_p4 }
  0x66   : > { %p859_p6 = pnand %p858_p13, %p852_p0 }
  0x68   : > { %862 = shalt.err (!%p859_p6)
}
  0x69   : > { %s863_s24 = scalar_lea.vmem %s1158_s6, 64  ;;  %s959_s30 = smov [#allocation3]  }
  0x6a   : > { %p864_p10 = scmp.ne.s32.totalorder %s1158_s6, %s863_s24  ;;  %s868_s14 = sshll.u32 %s959_s30, 4  ;;  %s869_s14 = int_to_ptr.vmem [resolvable:$false] %s868_s14 }
  0x6b   : > { %s870_s20 = scalar_lea.vmem %s869_s14, 128  ;;  %p871_p12 = scmp.lt.s32.totalorder %s1158_s6, %s869_s14 }
  0x6c   : > { %p866_p3 = pnand %p864_p10, %p850_p9  ;;  %p872_p1 = scmp.lt.s32.totalorder %s870_s20, %s863_s24 }
  0x6e   : > { %p867_p7 = pneg %p866_p3  ;;  %p873_p2 = por %p872_p1, %p871_p12 }
  0x70   : > { %p874_p4 = pnand %p873_p2, %p867_p7 }
  0x72   : > { %877 = shalt.err (!%p874_p4)
}
  0x73   : > { %711 = dma.hbm_to_vmem [thread:$0]  (!%p1154_p11), %s1152_s29, 64, %s1158_s6, %s195_s8  }
  0x74   : > { %p1272_p0 = scmp.ne.s32.totalorder %s1266_s23, 0 }
  0x75   : > { %s1188_s5 = sand.u32 (!%p1272_p0), 1, %s944_s16   ;;  %p1273_p9 = scmp.ne.s32.totalorder (!%p1272_p0), %s1264_s21, 0 }
  0x76   : > { %214 = sbr.rel (%p1272_p0) target bundleno = 594 (0x252), region = 36  ;;  %s579_s9 = sshll.u32 (!%p1272_p0), %s1188_s5, 2 }
  0x77   : > { %s217_s28 = scalar_lea.sflag (!%p1272_p0), [#allocation4], %s1188_s5  ;;  %s220_s11 = scalar_lea.vmem (!%p1272_p0), [#allocation3], %s579_s9 }
  0x7d   : > { %923 = dma.done.wait (%p1273_p9), %s217_s28, 64  }
  0x7e   : > { %925 = vsyncadd (%p1273_p9), %s217_s28, 4294967232  ;;  %p1274_p11 = scmp.eq.s32.totalorder %s1010_s19, 0 }
  0x80   : > { %927 = dma.done.wait (%p1274_p11), [#allocation7], 512   ;;  %p1275_p8 = pmov %p1274_p11 }
  0x82   : > { %929 = vsyncadd (%p1275_p8), [#allocation7], 4294966784  ;;  %p1276_p13 = pmov %p1275_p8 }
  0x83   : > { %p1277_p6 = pmov %p1275_p8 }
  0x84   : > { %931 = dma.done.wait (%p1276_p13), [#allocation10], 2048  }
  0x85   : > { %933 = vsyncadd (%p1277_p6), [#allocation10], 4294965248  ;;  %v960_v0 = vmov 0.0|0.0   ;;  %vm961_vm0 = vmmov 0   ;;  %v962_v1 = vmov 0.0   ;;  %v258_v2 = vld [vmem:[#allocation8] sm:$0xff] }
  0x86   : > { %655 = vmatprep.subr.bf16.mxu0 %v960_v0  ;;  %617 = vmatprep.mubr.msk.f32.mxu0 %vm961_vm0, %v962_v1  ;;  %v259_v3 = vld [vmem:[#allocation8 + $0x8] sm:$0xff]  ;;  %v370_v5 = vld [vmem:[#allocation9] sm:$0xff]  ;;  %v371_v6 = vld [vmem:[#allocation9 + $0x8] sm:$0xff]  ;;  %vm260_vm1 = vcmask 130048   ;;  %s256_s21 = scalar_lea.vmem [#allocation11], %s579_s9  ;;  %s590_s29 = sshll.u32 %s1010_s19, 6 }
  0x87   : > { %658 = vmatprep.subr.bf16.mxu1 %v960_v0  ;;  %652 = vmatprep.mubr.msk.f32.mxu1 %vm961_vm0, %v962_v1  ;;  %v656_v4 = vpack.c.bf16 %v259_v3, %v258_v2  ;;  %v372_v7 = vld [vmem:[#allocation9 + $0x10] sm:$0xff]  ;;  %v659_v8 = vpack.c.bf16 %v371_v6, %v370_v5  ;;  %v373_v9 = vld [vmem:[#allocation9 + $0x18] sm:$0xff]  ;;  %v374_v12 = vld [vmem:[#allocation9 + $0x20] sm:$0xff]  ;;  %s471_s23 = sshll.u32 %s256_s21, 4  ;;  %s1214_s8 = scalar_lea.hbm %s1260_s4, %s590_s29  ;;  %s1209_s23 = int_to_ptr.vmem [resolvable:$true] %s471_s23 }
  0x88   : > { %v257_v10 = vld [vmem:[%s220_s11] sm:$0xf]  ;;  %v662_v11 = vpack.c.bf16 %v373_v9, %v372_v7  ;;  %v375_v13 = vld [vmem:[#allocation9 + $0x28] sm:$0xff]  ;;  %v376_v15 = vld [vmem:[#allocation9 + $0x30] sm:$0xff]  ;;  %s458_s26 = scalar_lea.sflag [#allocation5], %s1188_s5  ;;  %s878_s25 = scalar_lea.vmem %s1209_s23, 64 }
  0x89   : > { %657 = vmatpush3.bf16.msra.mxu0 %v656_v4  ;;  %660 = vmatpush3.bf16.msra.mxu1 %v659_v8  ;;  %v665_v14 = vpack.c.bf16 %v375_v13, %v374_v12  ;;  %v377_v16 = vld [vmem:[#allocation9 + $0x38] sm:$0xff]  ;;  %v378_v18 = vld [vmem:[#allocation9 + $0x40] sm:$0xff]  ;;  %v379_v19 = vld [vmem:[#allocation9 + $0x48] sm:$0xff]  ;;  %p879_p10 = scmp.ne.s32.totalorder %s1209_s23, %s878_s25  ;;  %s963_s19 = smov [#allocation11]  }
  0x8a   : > { %661 = vmatprep.subr.bf16.mxu1 %v960_v0  ;;  %v668_v17 = vpack.c.bf16 %v377_v16, %v376_v15  ;;  %v671_v20 = vpack.c.bf16 %v379_v19, %v378_v18  ;;  %v380_v21 = vld [vmem:[#allocation9 + $0x50] sm:$0xff]  ;;  %v381_v22 = vld [vmem:[#allocation9 + $0x58] sm:$0xff]  ;;  %v382_v24 = vld [vmem:[#allocation9 + $0x60] sm:$0xff]  ;;  %s882_s27 = sshll.u32 %s963_s19, 4  ;;  %s883_s27 = int_to_ptr.vmem [resolvable:$false] %s882_s27 }
  0x8b   : > { %v674_v23 = vpack.c.bf16 %v381_v22, %v380_v21  ;;  %v383_v25 = vld [vmem:[#allocation9 + $0x68] sm:$0xff]  ;;  %v384_v27 = vld [vmem:[#allocation9 + $0x70] sm:$0xff]  ;;  %v385_v28 = vld [vmem:[#allocation9 + $0x78] sm:$0xff]  ;;  %p880_p3 = pnand %p879_p10, %p1143_p5  ;;  %s884_s24 = scalar_lea.vmem %s883_s27, 128 }
  0x8c   : > { %618 = vmatmul.mubr.msk.f32.vlgmr.msra.gmra.mrb[0].mxu0 %vm260_vm1, %v257_v10  ;;  %v677_v26 = vpack.c.bf16 %v383_v25, %v382_v24  ;;  %v680_v29 = vpack.c.bf16 %v385_v28, %v384_v27  ;;  %v336_v32 = vld [vmem:[#allocation6] sm:$0xf]  ;;  %v345_v33 = vld [vmem:[#allocation6 + $0x4] sm:$0xf]  ;;  %v354_v34 = vld [vmem:[#allocation6 + $0x8] sm:$0xf]  ;;  %p885_p12 = scmp.lt.s32.totalorder %s1209_s23, %s883_s27  ;;  %p886_p1 = scmp.lt.s32.totalorder %s884_s24, %s878_s25 }
  0x8d   : > { %663 = vmatpush3.bf16.msra.mxu1 %v662_v11  ;;  %v363_v41 = vld [vmem:[#allocation6 + $0xc] sm:$0xf]  ;;  %p881_p7 = pneg %p880_p3 }
  0x8e   : > { %664 = vmatprep.subr.bf16.mxu1 %v960_v0  ;;  %p887_p2 = por %p886_p1, %p885_p12 }
  0x90   : > { %p888_p4 = pnand %p887_p2, %p881_p7 }
  0x91   : > { %666 = vmatpush3.bf16.msra.mxu1 %v665_v14 }
  0x92   : > { %667 = vmatprep.subr.bf16.mxu1 %v960_v0 }
  0x95   : > { %669 = vmatpush3.bf16.msra.mxu1 %v668_v17 }
  0x96   : > { %670 = vmatprep.subr.bf16.mxu1 %v960_v0 }
  0x99   : > { %672 = vmatpush3.bf16.msra.mxu1 %v671_v20 }
  0x9a   : > { %673 = vmatprep.subr.bf16.mxu1 %v960_v0 }
  0x9d   : > { %675 = vmatpush3.bf16.msra.mxu1 %v674_v23 }
  0x9e   : > { %676 = vmatprep.subr.bf16.mxu1 %v960_v0 }
  0xa1   : > { %678 = vmatpush3.bf16.msra.mxu1 %v677_v26 }
  0xa2   : > { %679 = vmatprep.subr.bf16.mxu1 %v960_v0 }
  0xa5   : > { %681 = vmatpush3.bf16.msra.mxu1 %v680_v29 }
 0x15f   : > { %v330_v30 = vpop.f32.mrb[0].mxu0 }
 0x160   : > { %334 = vst [vmem:[#allocation2] sm:$0xf] %v330_v30  ;;  %v619_v31 = vpop.f32.mrb[1].mxu0 }
 0x167   : > { %v585_v35 = vld [vmem:[#allocation2] ss:$0 sm:$0xff]  ;;  %v586_v36 = vld [vmem:[#allocation2 + $0x1] ss:$0 sm:$0xff]  ;;  %v587_v37 = vld [vmem:[#allocation2 + $0x2] ss:$0 sm:$0xff] }
 0x168   : > { %v341_v38 = vmul.f32 %v585_v35, %v336_v32  ;;  %v350_v39 = vmul.f32 %v586_v36, %v345_v33  ;;  %v588_v40 = vld [vmem:[#allocation2 + $0x3] ss:$0 sm:$0xff]  ;;  %v359_v43 = vmul.f32 %v587_v37, %v354_v34 }
 0x169   : > { %v368_v45 = vmul.f32 %v588_v40, %v363_v41 }
 0x16a   : > { %v351_v42 = vadd.f32 %v350_v39, %v341_v38 }
 0x16c   : > { %v360_v44 = vadd.f32 %v359_v43, %v351_v42 }
 0x16e   : > { %v369_v46 = vadd.f32 %v368_v45, %v360_v44 }
 0x170   : > { %653 = vmatmul.mubr.f32.vlgmr.msra.gmra.mrb[0].mxu1 %v369_v46 }
 0x243   : > { %v452_v47 = vpop.f32.mrb[0].mxu1 }
 0x244   : > { %456 = vst [vmem:[%s256_s21] sm:$0xf] %v452_v47  ;;  %v654_v48 = vpop.f32.mrb[1].mxu1 }
 0x245   : > { %891 = shalt.err (!%p888_p4)
}
 0x246   : > { %s892_s30 = scalar_lea.hbm %s1214_s8, 64  ;;  %s896_s5 = scalar_lea.hbm %s1260_s4, 128 }
 0x247   : > { %p893_p0 = scmp.ne.s32.totalorder %s1214_s8, %s892_s30  ;;  %p897_p8 = scmp.lt.u32.totalorder %s1214_s8, %s1260_s4 }
 0x248   : > { %p898_p13 = scmp.lt.u32.totalorder %s896_s5, %s892_s30  ;;  %p900_p10 = scmp.lt.u32.totalorder %s892_s30, %s1214_s8 }
 0x249   : > { %p894_p9 = pnand %p893_p0, %p1143_p5 }
 0x24a   : > { %p899_p6 = por %p898_p13, %p897_p8 }
 0x24b   : > { %p895_p11 = pneg %p894_p9 }
 0x24c   : > { %p901_p3 = por %p900_p10, %p899_p6 }
 0x24e   : > { %p902_p7 = pnand %p901_p3, %p895_p11 }
 0x250   : > { %905 = shalt.err (!%p902_p7)
}
 0x251   : > { %696 = dma.vmem_to_hbm [thread:$0]  (%p1143_p5), %s1209_s23, 64, %s1214_s8, %s458_s26  }
 0x252 PF: > { %s483_s11 = sand.u32 1, %s940_s15   ;;  %p1278_p12 = scmp.ne.s32.totalorder %s1265_s22, 0 }
 0x253   : > { %p1279_p1 = scmp.ge.s32.totalorder %s952_s18, 2  ;;  %s484_s21 = scalar_lea.sflag [#allocation5], %s483_s11 }
 0x255   : > { %p713_p2 = pnand %p1279_p1, %p1278_p12 }
 0x257   : > { %935 = dma.done.wait (!%p713_p2), %s484_s21, 64  }
 0x258   : > { %937 = vsyncadd (!%p713_p2), %s484_s21, 4294967232  ;;  %p19_p4 = scmp.ge.s32.totalorder %s1129_s10, 4   ;;  %s1280_s15 = smov %s944_s16 }
 0x259   : > { %s1281_s16 = smov %s948_s17  ;;  %s1282_s17 = smov %s1139_s12 }
 0x25a   : > { %s1283_s18 = smov %s1129_s10  ;;  %21 = sbr.rel (!%p19_p4) target bundleno = 7 (0x7), region = 96 }
 0x261   :  { %489 = vsyncpa [#allocation4], 1 }
 0x262   :  { %491 = vsyncpa [#allocation4 + $0x1], 1 }
 0x263   :  { %492 = vsyncpa [#allocation7], 1 }
 0x264   :  { %493 = vsyncpa [#allocation10], 1 }
 0x265   :  { %494 = vsyncpa [#allocation5], 1 }
 0x266   :  { %496 = vsyncpa [#allocation5 + $0x1], 1 }

</bundles_post_ra>
